<compile_context>
chip_gen: v7x
topology: tpu7x:2x2x1
jax: 0.10.0
libtpu: 0.0.40
codegen_flags: <defaults>
</compile_context>

<pallas_src>
import jax
import jax.numpy as jnp
from jax.experimental import pallas as pl
from jax.experimental.pallas import tpu as pltpu


_LANE = 128
_SUBLANE = 8
# Working-set budget for ONE grid step (double-buffered logits + in-kernel f32
# intermediates + scratch).  Leaves headroom under the 32 MiB scoped-VMEM
# default of v6e/v7x and well under v7x's 64 MiB physical VMEM per core.
_VMEM_WORKSET_BUDGET = 24 * 1024 * 1024
_VMEM_LIMIT_BYTES = 32 * 1024 * 1024          # also raises v5e's 16 MiB default
_MAX_BLOCK_C = 2048                            # class-axis tile for vocab-sized C


def _round_up(x, m):
    return ((x + m - 1) // m) * m


def _ce_online_kernel(true_n_ref, logits_ref, tgt_ref, out_ref,
                      m_ref, l_ref, picked_ref):
    """Online-softmax cross-entropy partial sums.

    Grid = (row_blocks [parallel], class_blocks [arbitrary]).
      logits_ref : [BN, BC]   native dtype (cast to f32 in-register)
      tgt_ref    : [BN, 1]    int32 class indices
      out_ref    : [1, 8, 128] f32 lane-dense slab (written at last class block)
      m/l/picked : [BN, 1]    f32 running max / running sum / raw target logit
    """
    i = pl.program_id(0)
    j = pl.program_id(1)
    block_n, block_c = logits_ref.shape

    @pl.when(j == 0)
    def _init():
        m_ref[...] = jnp.full_like(m_ref, -jnp.inf)
        l_ref[...] = jnp.zeros_like(l_ref)
        picked_ref[...] = jnp.zeros_like(picked_ref)

    x = logits_ref[...].astype(jnp.float32)                        # [BN, BC]

    # --- online softmax normalizer update ---------------------------------
    m_prev = m_ref[...]
    m_new = jnp.maximum(m_prev, jnp.max(x, axis=-1, keepdims=True))
    alpha = jnp.exp(m_prev - m_new)                                # 0 at j == 0
    l_ref[...] = alpha * l_ref[...] + jnp.sum(jnp.exp(x - m_new),
                                              axis=-1, keepdims=True)
    m_ref[...] = m_new

    # --- gather raw target logit (row max cancels in lse - x_tgt) ----------
    cols = jax.lax.broadcasted_iota(jnp.int32, x.shape, 1) + j * block_c
    picked_ref[...] += jnp.sum(jnp.where(cols == tgt_ref[...], x, 0.0),
                               axis=-1, keepdims=True)

    @pl.when(j == pl.num_programs(1) - 1)
    def _finalize():
        lse = m_ref[...] + jnp.log(l_ref[...])                     # [BN, 1]
        per_row = lse - picked_ref[...]
        rows = (jax.lax.broadcasted_iota(jnp.int32, (block_n, 1), 0)
                + i * block_n)
        valid = (rows < true_n_ref[0]).astype(jnp.float32)
        partial = jnp.sum(per_row * valid)
        out_ref[...] = jnp.full(out_ref.shape, partial, dtype=jnp.float32)


def _choose_tiles(n, c, itemsize, block_n=None, block_c=None):
    """Pick (block_n, block_c, n_pad, c_pad) under the VMEM working-set budget."""
    if block_c is None:
        block_c = c if c <= _MAX_BLOCK_C else _MAX_BLOCK_C
    c_pad = c if block_c == c else _round_up(c, block_c)

    n_rounded = _round_up(n, _SUBLANE)
    if block_n is None:
        # Per-row VMEM bytes at one grid step:
        #   2x double-buffered native-dtype logits tile
        # + ~4x [BN, BC] f32 in-kernel intermediates (cast, exp, iota, mask)
        # + 2x lane-padded int32 target tile + 3x lane-padded f32 accumulators
        per_row = (2 * block_c * itemsize
                   + 4 * block_c * 4
                   + 2 * _LANE * 4
                   + 3 * _LANE * 4)
        bn = _VMEM_WORKSET_BUDGET // max(1, per_row)
        bn = max(_SUBLANE, (bn // _SUBLANE) * _SUBLANE)
        bn = min(bn, n_rounded)
        # Prefer >= 2 row blocks (v7x megacore sharding + DMA/compute
        # pipelining) as long as the logits tile stays >= ~1 MiB.
        half = max(_SUBLANE, ((n_rounded // 2) // _SUBLANE) * _SUBLANE)
        if 2 * half <= n_rounded and half * block_c * itemsize >= (1 << 20):
            bn = min(bn, half)
        block_n = bn

    n_pad = _round_up(n_rounded, block_n)
    return block_n, block_c, n_pad, c_pad


def custom_entropy_loss(output, target, lin_weight, conv_weight, lambdas,
                        block_n=None, block_c=None):
    """output: [N, C] logits (any float dtype), target: [N] int labels.
    lin_weight:  square [H, H] Linear weight   (layer_indices hit #0)
    conv_weight: OIHW Conv2d weight            (layer_indices hit #1)
    lambdas: (lambda_linear, lambda_conv)
    """
    n, c = output.shape
    itemsize = jnp.dtype(output.dtype).itemsize
    block_n, block_c, n_pad, c_pad = _choose_tiles(
        n, c, itemsize, block_n=block_n, block_c=block_c)
    num_row_blocks = n_pad // block_n
    num_class_blocks = c_pad // block_c

    # Pad with the most-negative finite value of the input dtype so padded
    # columns vanish under exp(); padded rows are masked in-kernel.
    pad_val = float(jnp.finfo(output.dtype).min)
    logits = output                                      # native dtype, no upcast
    tgt2d = target.astype(jnp.int32).reshape(n, 1)
    if n_pad != n or c_pad != c:
        logits = jnp.pad(logits, ((0, n_pad - n), (0, c_pad - c)),
                         constant_values=pad_val)
    if n_pad != n:
        tgt2d = jnp.pad(tgt2d, ((0, n_pad - n), (0, 0)))

    true_n = jnp.array([n], dtype=jnp.int32)             # SMEM scalar prefetch

    # Explicit scoped-VMEM limit that covers the budgeted working set
    # (>= 32 MiB so v5e's 16 MiB default is lifted; <= 60 MiB for v7x safety).
    est_bytes = (2 * block_n * block_c * itemsize
                 + 4 * block_n * block_c * 4
                 + 2 * block_n * _LANE * 4
                 + 3 * block_n * _LANE * 4
                 + 2 * _SUBLANE * _LANE * 4)
    vmem_limit = int(min(60 * 1024 * 1024,
                         max(_VMEM_LIMIT_BYTES, int(est_bytes * 1.25))))

    partials = pl.pallas_call(
        _ce_online_kernel,
        out_shape=jax.ShapeDtypeStruct((num_row_blocks, _SUBLANE, _LANE),
                                       jnp.float32),
        grid_spec=pltpu.PrefetchScalarGridSpec(
            num_scalar_prefetch=1,
            grid=(num_row_blocks, num_class_blocks),
            in_specs=[
                pl.BlockSpec((block_n, block_c), lambda i, j, tn: (i, j)),
                pl.BlockSpec((block_n, 1), lambda i, j, tn: (i, 0)),
            ],
            out_specs=pl.BlockSpec((1, _SUBLANE, _LANE),
                                   lambda i, j, tn: (i, 0, 0)),
            scratch_shapes=[pltpu.VMEM((block_n, 1), jnp.float32)] * 3,
        ),
        compiler_params=pltpu.CompilerParams(
            dimension_semantics=("parallel", "arbitrary"),
            vmem_limit_bytes=vmem_limit),
    )(true_n, logits, tgt2d)

    mean_ce = jnp.sum(partials[:, 0, 0]) / jnp.float32(n)

    # TODO(synk): torch.det has no Pallas primitive; the tiny determinant of
    # the square Linear weight is computed with jnp.linalg.det in plain JAX.
    det_w = jnp.linalg.det(lin_weight.astype(jnp.float32))
    first_filter = conv_weight[0, 0, 0, 0].astype(jnp.float32)
    entropy = (-jnp.float32(lambdas[0]) * jnp.log(jnp.abs(det_w) + 1e-6)
               - jnp.float32(lambdas[1]) * jnp.log(jnp.abs(first_filter) + 1e-6))
    return mean_ce + entropy


def _reference_loss(output, target, lin_weight, conv_weight, lambdas):
    # plain-JAX reference (mirrors the PyTorch module) for the self-check
    logits = output.astype(jnp.float32)
    lse = jax.scipy.special.logsumexp(logits, axis=-1)
    picked = jnp.take_along_axis(logits, target[:, None], axis=-1)[:, 0]
    base = jnp.mean(lse - picked)
    det_w = jnp.linalg.det(lin_weight.astype(jnp.float32))
    ff = conv_weight[0, 0, 0, 0].astype(jnp.float32)
    ent = (-lambdas[0] * jnp.log(jnp.abs(det_w) + 1e-6)
           - lambdas[1] * jnp.log(jnp.abs(ff) + 1e-6))
    return base + ent


if __name__ == "__main__":
    key = jax.random.PRNGKey(0)
    (k_logit, k_tgt, k_lin, k_conv,
     k_logit2, k_tgt2, k_logit3, k_tgt3) = jax.random.split(key, 8)

    H = 32                       # square Linear weight -> det path is exercised
    conv_shape = (4, 4, 3, 3)    # OIHW
    lin_weight = 0.3 * jax.random.normal(k_lin, (H, H), dtype=jnp.float32)
    conv_weight = 0.1 * jax.random.normal(k_conv, conv_shape, dtype=jnp.float32)
    lambdas = (0.5, 0.25)        # layer_indices = [0, 1]

    # Case 1: small aligned shapes (batch=8, classes=32)
    N, C = 8, 32
    output = jax.random.normal(k_logit, (N, C), dtype=jnp.float32)
    target = jax.random.randint(k_tgt, (N,), 0, C, dtype=jnp.int32)
    loss = jax.block_until_ready(
        custom_entropy_loss(output, target, lin_weight, conv_weight, lambdas))
    ref = _reference_loss(output, target, lin_weight, conv_weight, lambdas)
    assert jnp.allclose(loss, ref, rtol=1e-4, atol=1e-4), (loss, ref)

    # Case 2: batch not a multiple of the tile -> exercises pad + row masking
    N2, C2 = 13, 40
    output2 = jax.random.normal(k_logit2, (N2, C2), dtype=jnp.float32)
    target2 = jax.random.randint(k_tgt2, (N2,), 0, C2, dtype=jnp.int32)
    loss2 = jax.block_until_ready(
        custom_entropy_loss(output2, target2, lin_weight, conv_weight, lambdas))
    ref2 = _reference_loss(output2, target2, lin_weight, conv_weight, lambdas)
    assert jnp.allclose(loss2, ref2, rtol=1e-4, atol=1e-4), (loss2, ref2)

    # Case 3: force the class-tiled online-softmax path + multiple row blocks
    # (C=300 with block_c=128 -> 3 class blocks; N=37 with block_n=16 -> 3 row
    # blocks with padded rows and padded class columns).
    N3, C3 = 37, 300
    output3 = jax.random.normal(k_logit3, (N3, C3), dtype=jnp.bfloat16)
    target3 = jax.random.randint(k_tgt3, (N3,), 0, C3, dtype=jnp.int32)
    loss3 = jax.block_until_ready(
        custom_entropy_loss(output3, target3, lin_weight, conv_weight, lambdas,
                            block_n=16, block_c=128))
    ref3 = _reference_loss(output3, target3, lin_weight, conv_weight, lambdas)
    assert jnp.allclose(loss3, ref3, rtol=2e-2, atol=2e-2), (loss3, ref3)

    print("KERNEL_OK")
</pallas_src>

<mosaic_0001>
module attributes {stable_mosaic.version = 11 : i64} {
  func.func @_ce_online_kernel(%arg0: i32, %arg1: i32, %arg2: memref<1xi32, #tpu.memory_space<smem>>, %arg3: memref<8x32xf32, #tpu.memory_space<vmem>>, %arg4: memref<8x1xi32, #tpu.memory_space<vmem>>, %arg5: memref<1x8x128xf32, #tpu.memory_space<vmem>>, %arg6: memref<8x1xf32, #tpu.memory_space<vmem>>, %arg7: memref<8x1xf32, #tpu.memory_space<vmem>>, %arg8: memref<8x1xf32, #tpu.memory_space<vmem>>) attributes {dimension_semantics = [#tpu.dimension_semantics<parallel>, #tpu.dimension_semantics<arbitrary>], iteration_bounds = array<i64: 1, 1>, scalar_prefetch = 1 : i64, scratch_operands = 3 : i64, tpu.core_type = #tpu.core_type<tc>, window_params = [{transform_indices = @transform_0, window_bounds = array<i64: 8, 32>}, {transform_indices = @transform_1, window_bounds = array<i64: 8, 1>}, {transform_indices = @transform_2, window_bounds = array<i64: 1, 8, 128>}]} {
    %c0_i32 = arith.constant 0 : i32
    %0 = arith.cmpi eq, %arg1, %c0_i32 : i32
    %1 = arith.extui %0 : i1 to i32
    %c0_i32_0 = arith.constant 0 : i32
    %2 = arith.cmpi ne, %1, %c0_i32_0 : i32
    scf.if %2 {
      %cst_21 = arith.constant 0xFF800000 : f32
      %37 = vector.broadcast %cst_21 : f32 to vector<8x1xf32>
      %c0_22 = arith.constant 0 : index
      %c0_23 = arith.constant 0 : index
      %38 = vector.load %arg6[%c0_22, %c0_23] : memref<8x1xf32, #tpu.memory_space<vmem>>, vector<8x1xf32>
      tpu.vector_store %arg6[%c0_22, %c0_23], %37 {strides = array<i32>} : memref<8x1xf32, #tpu.memory_space<vmem>>, vector<8x1xf32>,
      %cst_24 = arith.constant 0.000000e+00 : f32
      %39 = vector.broadcast %cst_24 : f32 to vector<8x1xf32>
      %c0_25 = arith.constant 0 : index
      %c0_26 = arith.constant 0 : index
      %40 = vector.load %arg7[%c0_25, %c0_26] : memref<8x1xf32, #tpu.memory_space<vmem>>, vector<8x1xf32>
      tpu.vector_store %arg7[%c0_25, %c0_26], %39 {strides = array<i32>} : memref<8x1xf32, #tpu.memory_space<vmem>>, vector<8x1xf32>,
      %cst_27 = arith.constant 0.000000e+00 : f32
      %41 = vector.broadcast %cst_27 : f32 to vector<8x1xf32>
      %c0_28 = arith.constant 0 : index
      %c0_29 = arith.constant 0 : index
      %42 = vector.load %arg8[%c0_28, %c0_29] : memref<8x1xf32, #tpu.memory_space<vmem>>, vector<8x1xf32>
      tpu.vector_store %arg8[%c0_28, %c0_29], %41 {strides = array<i32>} : memref<8x1xf32, #tpu.memory_space<vmem>>, vector<8x1xf32>,
    } else {
    }
    %c0 = arith.constant 0 : index
    %c0_1 = arith.constant 0 : index
    %3 = vector.load %arg3[%c0, %c0_1] : memref<8x32xf32, #tpu.memory_space<vmem>>, vector<8x32xf32>
    %c0_2 = arith.constant 0 : index
    %c0_3 = arith.constant 0 : index
    %4 = vector.load %arg6[%c0_2, %c0_3] : memref<8x1xf32, #tpu.memory_space<vmem>>, vector<8x1xf32>
    %cst = arith.constant dense<0xFF800000> : vector<8xf32>
    %5 = vector.multi_reduction <maximumf>, %3, %cst [1] : vector<8x32xf32> to vector<8xf32>
    %6 = vector.shape_cast %5 : vector<8xf32> to vector<8x1xf32>
    %7 = arith.maximumf %4, %6 : vector<8x1xf32>
    %8 = arith.subf %4, %7 : vector<8x1xf32>
    %9 = math.exp %8 : vector<8x1xf32>
    %c0_4 = arith.constant 0 : index
    %c0_5 = arith.constant 0 : index
    %10 = vector.load %arg7[%c0_4, %c0_5] : memref<8x1xf32, #tpu.memory_space<vmem>>, vector<8x1xf32>
    %11 = arith.mulf %9, %10 : vector<8x1xf32>
    %12 = vector.broadcast %7 : vector<8x1xf32> to vector<8x32xf32>
    %13 = arith.subf %3, %12 : vector<8x32xf32>
    %14 = math.exp %13 : vector<8x32xf32>
    %cst_6 = arith.constant dense<0.000000e+00> : vector<8xf32>
    %15 = vector.multi_reduction <add>, %14, %cst_6 [1] : vector<8x32xf32> to vector<8xf32>
    %16 = vector.shape_cast %15 : vector<8xf32> to vector<8x1xf32>
    %17 = arith.addf %11, %16 : vector<8x1xf32>
    %c0_7 = arith.constant 0 : index
    %c0_8 = arith.constant 0 : index
    %18 = vector.load %arg7[%c0_7, %c0_8] : memref<8x1xf32, #tpu.memory_space<vmem>>, vector<8x1xf32>
    tpu.vector_store %arg7[%c0_7, %c0_8], %17 {strides = array<i32>} : memref<8x1xf32, #tpu.memory_space<vmem>>, vector<8x1xf32>,
    %c0_9 = arith.constant 0 : index
    %c0_10 = arith.constant 0 : index
    %19 = vector.load %arg6[%c0_9, %c0_10] : memref<8x1xf32, #tpu.memory_space<vmem>>, vector<8x1xf32>
    tpu.vector_store %arg6[%c0_9, %c0_10], %7 {strides = array<i32>} : memref<8x1xf32, #tpu.memory_space<vmem>>, vector<8x1xf32>,
    %20 = tpu.iota {dimensions = array<i32: 1>} : vector<8x32xi32>
    %c32_i32 = arith.constant 32 : i32
    %21 = arith.muli %arg1, %c32_i32 : i32
    %22 = vector.broadcast %21 : i32 to vector<8x32xi32>
    %23 = arith.addi %20, %22 : vector<8x32xi32>
    %c0_11 = arith.constant 0 : index
    %c0_12 = arith.constant 0 : index
    %24 = vector.load %arg8[%c0_11, %c0_12] : memref<8x1xf32, #tpu.memory_space<vmem>>, vector<8x1xf32>
    %c0_13 = arith.constant 0 : index
    %c0_14 = arith.constant 0 : index
    %25 = vector.load %arg4[%c0_13, %c0_14] : memref<8x1xi32, #tpu.memory_space<vmem>>, vector<8x1xi32>
    %26 = vector.broadcast %25 : vector<8x1xi32> to vector<8x32xi32>
    %27 = arith.cmpi eq, %23, %26 : vector<8x32xi32>
    %cst_15 = arith.constant 0.000000e+00 : f32
    %28 = vector.broadcast %cst_15 : f32 to vector<8x32xf32>
    %29 = arith.select %27, %3, %28 : vector<8x32xi1>, vector<8x32xf32>
    %cst_16 = arith.constant dense<0.000000e+00> : vector<8xf32>
    %30 = vector.multi_reduction <add>, %29, %cst_16 [1] : vector<8x32xf32> to vector<8xf32>
    %31 = vector.shape_cast %30 : vector<8xf32> to vector<8x1xf32>
    %32 = arith.addf %24, %31 : vector<8x1xf32>
    %c0_17 = arith.constant 0 : index
    %c0_18 = arith.constant 0 : index
    %33 = vector.load %arg8[%c0_17, %c0_18] : memref<8x1xf32, #tpu.memory_space<vmem>>, vector<8x1xf32>
    tpu.vector_store %arg8[%c0_17, %c0_18], %32 {strides = array<i32>} : memref<8x1xf32, #tpu.memory_space<vmem>>, vector<8x1xf32>,
    %c0_i32_19 = arith.constant 0 : i32
    %34 = arith.cmpi eq, %arg1, %c0_i32_19 : i32
    %35 = arith.extui %34 : i1 to i32
    %c0_i32_20 = arith.constant 0 : i32
    %36 = arith.cmpi ne, %35, %c0_i32_20 : i32
    scf.if %36 {
      %c0_21 = arith.constant 0 : index
      %c0_22 = arith.constant 0 : index
      %37 = vector.load %arg6[%c0_21, %c0_22] : memref<8x1xf32, #tpu.memory_space<vmem>>, vector<8x1xf32>
      %c0_23 = arith.constant 0 : index
      %c0_24 = arith.constant 0 : index
      %38 = vector.load %arg7[%c0_23, %c0_24] : memref<8x1xf32, #tpu.memory_space<vmem>>, vector<8x1xf32>
      %39 = math.log %38 : vector<8x1xf32>
      %40 = arith.addf %37, %39 : vector<8x1xf32>
      %c0_25 = arith.constant 0 : index
      %c0_26 = arith.constant 0 : index
      %41 = vector.load %arg8[%c0_25, %c0_26] : memref<8x1xf32, #tpu.memory_space<vmem>>, vector<8x1xf32>
      %42 = arith.subf %40, %41 : vector<8x1xf32>
      %43 = tpu.iota {dimensions = array<i32: 0>} : vector<8x1xi32>
      %c8_i32 = arith.constant 8 : i32
      %44 = arith.muli %arg0, %c8_i32 : i32
      %45 = vector.broadcast %44 : i32 to vector<8x1xi32>
      %46 = arith.addi %43, %45 : vector<8x1xi32>
      %c0_27 = arith.constant 0 : index
      %47 = memref.load %arg2[%c0_27] : memref<1xi32, #tpu.memory_space<smem>>
      %48 = vector.broadcast %47 : i32 to vector<8x1xi32>
      %49 = arith.cmpi slt, %46, %48 : vector<8x1xi32>
      %50 = arith.extui %49 : vector<8x1xi1> to vector<8x1xi32>
      %51 = arith.sitofp %50 : vector<8x1xi32> to vector<8x1xf32>
      %52 = arith.mulf %42, %51 : vector<8x1xf32>
      %53 = vector.shape_cast %52 : vector<8x1xf32> to vector<1x8x1xf32>
      %cst_28 = arith.constant dense<0.000000e+00> : vector<1xf32>
      %54 = vector.multi_reduction <add>, %53, %cst_28 [1, 2] : vector<1x8x1xf32> to vector<1xf32>
      %55 = vector.shape_cast %54 : vector<1xf32> to vector<1x1x1xf32>
      %56 = vector.extract %55[0, 0, 0] : f32 from vector<1x1x1xf32>
      %57 = vector.broadcast %56 : f32 to vector<1x8x128xf32>
      %c0_29 = arith.constant 0 : index
      %c0_30 = arith.constant 0 : index
      %c0_31 = arith.constant 0 : index
      %58 = vector.load %arg5[%c0_29, %c0_30, %c0_31] : memref<1x8x128xf32, #tpu.memory_space<vmem>>, vector<1x8x128xf32>
      tpu.vector_store %arg5[%c0_29, %c0_30, %c0_31], %57 {strides = array<i32>} : memref<1x8x128xf32, #tpu.memory_space<vmem>>, vector<1x8x128xf32>,
    } else {
    }
    return
  }
  func.func @transform_0(%arg0: i32, %arg1: i32, %arg2: memref<1xi32, #tpu.memory_space<smem>>) -> (i32, i32) {
    %c0_i32 = arith.constant 0 : i32
    return %arg0, %arg1 : i32, i32
  }
  func.func @transform_1(%arg0: i32, %arg1: i32, %arg2: memref<1xi32, #tpu.memory_space<smem>>) -> (i32, i32) {
    %c0_i32 = arith.constant 0 : i32
    %c0_i32_0 = arith.constant 0 : i32
    return %arg0, %c0_i32 : i32, i32
  }
  func.func @transform_2(%arg0: i32, %arg1: i32, %arg2: memref<1xi32, #tpu.memory_space<smem>>) -> (i32, i32, i32) {
    %c0_i32 = arith.constant 0 : i32
    %c0_i32_0 = arith.constant 0 : i32
    %c0_i32_1 = arith.constant 0 : i32
    return %arg0, %c0_i32, %c0_i32_0 : i32, i32, i32
  }
}

</mosaic_0001>

<bundles_post_ra>
// kernel: tpu_custom_call.1
= control target key start
LH: loop header
LB: loop body
LE: loop exit
PB: predicated region body
PF: predicated region fallthrough
CT: control target
= control target key end

     0   :  { %vm24_vm0 = vcmask 261120   ;;  %s207_s0 = inlined_call_operand.<no memory space> [shape: s32[1], index: 0, kind: input, shape index: {}]   ;;  %s208_s1 = inlined_call_operand.vmem [shape: f32[8,32], index: 1, kind: input, shape index: {}]   ;;  %s209_s2 = inlined_call_operand.vmem [shape: s32[8,1], index: 2, kind: input, shape index: {}]   ;;  %s210_s3 = inlined_call_operand.hbm [shape: f32[1,8,128], index: 3, kind: output, shape index: {}]  }
   0x1   :  { %v22_v0 = vld [vmem:[%s208_s1] sm:$0xff] }
   0x2   :  { %9 = vsyncpa [#allocation8], 0  ;;  %v25_v1 = vsel %vm24_vm0, %v22_v0, -inf  ;;  %vm18_vm1 = vcmask 7168   ;;  %v152_v2 = vmov -inf   ;;  %v153_v3 = vmov 0  }
   0x3   :  { %26 = vmax.xlane.f32.xlu0 %v25_v1  ;;  %19 = vst.msk [vmem:[#allocation2] sm:$0xff] %vm18_vm1, %v152_v2  ;;  %121 = vset.pattern.permute.xlu1 %v153_v3  ;;  %v55_v4 = vld [vmem:[%s209_s2] sm:$0xff]  ;;  %v154_v5 = vmov 0.0   ;;  %v49_v13 = vlaneseq  ;;  %v82_v31 = vstv %s207_s0  ;;  %s155_s0 = smov [#allocation7]  }
   0x4   :  { %120 = vset.pattern.permute.xlu0 %v153_v3  ;;  %57 = vperm.xlu1 %121, %v55_v4   ;;  %20 = vst.msk [vmem:[#allocation3] sm:$0xff] %vm18_vm1, %v154_v5  ;;  %21 = vst.msk [vmem:[#allocation4] sm:$0xff] %vm18_vm1, %v154_v5  ;;  %s105_s16 = sshll.u32 %s155_s0, 4  ;;  %s106_s16 = int_to_ptr.vmem [resolvable:$true] %s105_s16 }
   0x5   :  { %v50_v14 = vand.u32 127, %v49_v13  ;;  %v77_v30 = vshrl.u32 %v49_v13, 7  ;;  %s128_s18 = scalar_lea.vmem %s106_s16, 128  ;;  %p133_p1 = scmp.lt.s32.totalorder %s106_s16, %s106_s16 }
   0x6   :  { %p129_p0 = scmp.ne.s32.totalorder %s106_s16, %s128_s18  ;;  %p134_p2 = scmp.lt.s32.totalorder %s128_s18, %s128_s18 }
   0x7   :  { %vm83_vm3 = vcmp.lt.s32.totalorder %v77_v30, %v82_v31 }
   0x8   :  { %v113_v37 = vsel %vm83_vm3, 1.0, %v154_v5  ;;  %p135_p3 = por %p134_p2, %p133_p1 }
   0xa   :  { %v23_v6 = vld [vmem:[#allocation2] sm:$0xff]  ;;  %p136_p4 = pnand %p135_p3, %p129_p0 }
   0xb   :  { %v32_v22 = vld [vmem:[#allocation3] sm:$0xff]  ;;  %v54_v26 = vld [vmem:[#allocation4] sm:$0xff] }
  0x83   :  { %v58_v15 = vpop.permute.xlu1 %57 }
  0x84   :  { %vm59_vm2 = vcmp.eq.s32.totalorder %v50_v14, %v58_v15 }
  0x85   :  { %v60_v17 = vsel %vm59_vm2, %v22_v0, 0.0 }
  0x86   :  { %v61_v19 = vsel %vm24_vm0, %v60_v17, 0.0 }
  0x90   :  { %v27_v7 = vpop.xlane.xlu0 %26 }
  0x91   :  { %v28_v8 = vmax.f32 %v23_v6, %v27_v7 }
  0x93   :  { %v29_v9 = vsub.f32 %v23_v6, %v28_v8  ;;  %48 = vst.msk [vmem:[#allocation2] sm:$0xff] %vm18_vm1, %v28_v8  ;;  %36 = vperm.xlu0 %120, %v28_v8  }
  0x95   :  { %v30_v20 = vmul.f32 1.442695, %v29_v9 }
  0x9a   :  { %v69_v34 = vld [vmem:[#allocation2] sm:$0xff] }
 0x112   :  { %v37_v10 = vpop.permute.xlu0 %36 }
 0x113   :  { %v39_v11 = vsub.f32 %v22_v0, %v37_v10 }
 0x115   :  { %v40_v12 = vmul.f32 1.442695, %v39_v11 }
 0x117   :  { %122 = vpow2.f32 %v40_v12 }
 0x118   :  { %124 = vpow2.f32 %v30_v20 }
 0x121   :  { %v123_v16 = vpop.eup %122 }
 0x122   :  { %v42_v18 = vsel %vm24_vm0, %v123_v16, 0.0  ;;  %v125_v21 = vpop.eup %124 }
 0x123   :  { %43 = vadd.xlane.f32.xlu1 %v42_v18  ;;  %v33_v23 = vmul.f32 %v125_v21, %v32_v22 }
 0x127   :  { %62 = vadd.xlane.f32.xlu1 %v61_v19 }
 0x1b0   :  { %v44_v24 = vpop.xlane.xlu1 %43 }
 0x1b1   :  { %v45_v25 = vadd.f32 %v44_v24, %v33_v23 }
 0x1b3   :  { %47 = vst.msk [vmem:[#allocation3] sm:$0xff] %vm18_vm1, %v45_v25 }
 0x1b4   :  { %v63_v27 = vpop.xlane.xlu1 %62 }
 0x1b5   :  { %v64_v28 = vadd.f32 %v63_v27, %v54_v26 }
 0x1b7   :  { %65 = vst.msk [vmem:[#allocation4] sm:$0xff] %vm18_vm1, %v64_v28 }
 0x1ba   :  { %v70_v29 = vld [vmem:[#allocation3] sm:$0xff] }
 0x1bb   :  { %126 = vlog2.f32 %v70_v29 }
 0x1be   :  { %v74_v35 = vld [vmem:[#allocation4] sm:$0xff] }
 0x1c5   :  { %v127_v32 = vpop.eup %126 }
 0x1c6   :  { %v72_v33 = vmul.f32 0.6931472, %v127_v32 }
 0x1c8   :  { %v73_v36 = vadd.f32 %v72_v33, %v69_v34 }
 0x1ca   :  { %v75_v38 = vsub.f32 %v73_v36, %v74_v35 }
 0x1cc   :  { %v86_v39 = vmul.f32 %v113_v37, %v75_v38 }
 0x1ce   :  { %v87_v40 = vsel %vm18_vm1, %v86_v39, 0.0 }
 0x1cf   :  { %88 = vadd.xlane.f32.xlu1 %v87_v40 }
 0x25c   :  { %v89_v41 = vpop.xlane.xlu1 %88 }
 0x25d   :  { %v90_v42 = vrot.slane %v89_v41, 4 }
 0x25f   :  { %v91_v43 = vadd.f32 %v90_v42, %v89_v41 }
 0x261   :  { %v92_v44 = vrot.slane %v91_v43, 2 }
 0x263   :  { %v93_v45 = vadd.f32 %v92_v44, %v91_v43 }
 0x265   :  { %v94_v46 = vrot.slane %v93_v45, 1 }
 0x267   :  { %v95_v47 = vadd.f32 %v94_v46, %v93_v45 }
 0x269   :  { %114 = vpush %v95_v47 }
 0x29a   :  { %s115_s17 = spop %114 }
 0x29b   :  { %v97_v48 = vstv %s115_s17 }
 0x29c   :  { %98 = vst [vmem:[#allocation7] sm:$0xff] %v97_v48 }
 0x29d   :  { %139 = shalt.err (!%p136_p4)
}
 0x29e   :  { %s140_s21 = scalar_lea.hbm %s210_s3, 128 }
 0x29f   :  { %p141_p5 = scmp.ne.s32.totalorder %s210_s3, %s140_s21  ;;  %p144_p6 = scmp.lt.u32.totalorder %s140_s21, %s210_s3 }
 0x2a1   :  { %p146_p7 = pnand %p144_p6, %p141_p5 }
 0x2a3   :  { %149 = shalt.err (!%p146_p7)
}
 0x2a4   :  { %108 = dma.vmem_to_hbm [thread:$0]  %s106_s16, 128, %s210_s3, [#allocation8]  }
 0x2a5   :  { %150 = dma.done.wait [#allocation8], 128  }
 0x2a6   :  { %151 = vsyncadd [#allocation8], 4294967168 }
 0x2a7   :  { %112 = vsyncpa [#allocation8], 1 }

</bundles_post_ra>
